<compile_context>
chip_gen: v7x
topology: tpu7x:2x2x1
jax: 0.10.0
libtpu: 0.0.40
codegen_flags: <defaults>
</compile_context>

<pallas_src>
import functools

import jax
import jax.numpy as jnp
from jax.experimental import pallas as pl
from jax.experimental.pallas import tpu as pltpu


def mlp_kernel(x_ref, w1_ref, b1_ref, w2_ref, b2_ref, w3_ref, b3_ref,
               h1_ref, packed_ref, *, out_lane):
    x = x_ref[...]                                     # (TB, d)

    # Layer 1: Linear(d, 400) + ReLU  (MXU, f32 accumulate)
    h1 = jnp.dot(x, w1_ref[...], preferred_element_type=jnp.float32) + b1_ref[...]
    h1 = jnp.maximum(h1, 0.0)                          # (TB, 400)
    h1_ref[...] = h1.astype(h1_ref.dtype)

    # Layer 2: Linear(400, 20) + ReLU, zero-padded to 128 lanes (lanes >= 20
    # have zero weights and zero bias -> exactly 0 after ReLU).
    h2 = jnp.dot(h1, w2_ref[...], preferred_element_type=jnp.float32) + b2_ref[...]
    h2 = jnp.maximum(h2, 0.0)                          # (TB, 128)

    # Layer 3: Linear(20, 1) + Sigmoid, on VPU/XLU instead of the MXU.
    # w3_ref is the (1, 128) zero-padded row of w3; padded lanes contribute 0.
    z = jnp.sum(h2 * w3_ref[...], axis=-1, keepdims=True) + b3_ref[...]   # (TB, 1)
    out = 1.0 / (1.0 + jnp.exp(-z))                    # exp on EUP

    # Pack the sigmoid output into spare lane `out_lane` of the h2 slab so the
    # store is a single lane-dense (TB, 128) write.
    lane = jax.lax.broadcasted_iota(jnp.int32, h2.shape, 1)
    out_b = jnp.broadcast_to(out, h2.shape)
    packed_ref[...] = jnp.where(lane == out_lane, out_b, h2).astype(packed_ref.dtype)


def _round_up(n, m):
    return ((n + m - 1) // m) * m


def mlp_forward(x, params, *, block_b=512):
    """Fused MLP forward. x: [B, d] float32 -> (out [B,1], h1 [B,400], h2 [B,20])."""
    w1, b1, w2, b2, w3, b3 = params
    B, d = x.shape
    H1 = w1.shape[1]                      # 400
    H2 = w2.shape[1]                      # 20
    H2P = _round_up(H2 + 1, 128)          # 128: lane-dense slab (h2 lanes + sigmoid lane)

    # Zero-pad layer-2/3 params out to the 128-lane slab (numerically identical).
    w2p = jnp.zeros((H1, H2P), w2.dtype).at[:, :H2].set(w2)
    b2p = jnp.zeros((1, H2P), b2.dtype).at[:, :H2].set(b2)
    w3p = jnp.zeros((1, H2P), w3.dtype).at[:, :H2].set(w3.reshape(1, H2))

    # Batch tile: at least 8 rows (sublane), at most block_b; pad B to a multiple.
    TB = min(block_b, _round_up(B, 8))
    B_pad = _round_up(B, TB)
    if B_pad != B:
        x = jnp.pad(x, ((0, B_pad - B), (0, 0)))

    grid = (B_pad // TB,)

    def row_spec(shape):   # batch-tiled operands
        return pl.BlockSpec(shape, lambda i: (i, 0))

    def rep_spec(shape):   # grid-invariant operands (stay VMEM-resident)
        return pl.BlockSpec(shape, lambda i: (0, 0))

    h1_pad, packed = pl.pallas_call(
        functools.partial(mlp_kernel, out_lane=H2),
        out_shape=(
            jax.ShapeDtypeStruct((B_pad, H1), jnp.float32),
            jax.ShapeDtypeStruct((B_pad, H2P), jnp.float32),
        ),
        grid=grid,
        in_specs=[
            row_spec((TB, d)),       # x
            rep_spec((d, H1)),       # w1
            rep_spec((1, H1)),       # b1
            rep_spec((H1, H2P)),     # w2 (padded)
            rep_spec((1, H2P)),      # b2 (padded)
            rep_spec((1, H2P)),      # w3 row (padded)
            rep_spec((1, 1)),        # b3
        ],
        out_specs=(
            row_spec((TB, H1)),      # layer1_out
            row_spec((TB, H2P)),     # packed [h2 | out | zeros]
        ),
        compiler_params=pltpu.CompilerParams(
            dimension_semantics=("parallel",)),
    )(x, w1, b1, w2p, b2p, w3p, b3)

    layer1_out = h1_pad[:B]
    layer2_out = packed[:B, :H2]
    out = packed[:B, H2:H2 + 1]
    return out, layer1_out, layer2_out


def init_params(key, d):
    """nn.Linear-style init (uniform +/- 1/sqrt(fan_in)); weights stored [in, out]."""
    # TODO(synk): torch.manual_seed(666) parameter values are not reproduced; jax.random is used.
    def linear_init(k, fan_in, fan_out):
        kw, kb = jax.random.split(k)
        bound = 1.0 / jnp.sqrt(jnp.float32(fan_in))
        w = jax.random.uniform(kw, (fan_in, fan_out), jnp.float32, -bound, bound)
        b = jax.random.uniform(kb, (1, fan_out), jnp.float32, -bound, bound)
        return w, b

    k1, k2, k3 = jax.random.split(key, 3)
    w1, b1 = linear_init(k1, d, 400)
    w2, b2 = linear_init(k2, 400, 20)
    w3, b3 = linear_init(k3, 20, 1)
    return (w1, b1, w2, b2, w3, b3)


def _reference(x, params):
    w1, b1, w2, b2, w3, b3 = params
    h1 = jnp.maximum(x @ w1 + b1, 0.0)
    h2 = jnp.maximum(h1 @ w2 + b2, 0.0)
    out = jax.nn.sigmoid(h2 @ w3 + b3)
    return out, h1, h2


if __name__ == "__main__":
    key = jax.random.PRNGKey(0)
    kx, kx2, kp = jax.random.split(key, 3)

    B, d = 8, 32
    params = init_params(kp, d)

    # Small case (single tile).
    x = jax.random.normal(kx, (B, d), dtype=jnp.float32)
    out, l1, l2 = jax.block_until_ready(mlp_forward(x, params))
    out_r, l1_r, l2_r = _reference(x, params)
    assert out.shape == (B, 1) and l1.shape == (B, 400) and l2.shape == (B, 20)
    assert jnp.allclose(out, out_r, atol=1e-5)
    assert jnp.allclose(l1, l1_r, atol=1e-5)
    assert jnp.allclose(l2, l2_r, atol=1e-5)

    # Larger, ragged case exercising the multi-tile pipelined grid + padding.
    B2 = 1100
    x2 = jax.random.normal(kx2, (B2, d), dtype=jnp.float32)
    out2, l1_2, l2_2 = jax.block_until_ready(mlp_forward(x2, params))
    out2_r, l1_2r, l2_2r = _reference(x2, params)
    assert out2.shape == (B2, 1) and l1_2.shape == (B2, 400) and l2_2.shape == (B2, 20)
    assert jnp.allclose(out2, out2_r, atol=1e-5)
    assert jnp.allclose(l1_2, l1_2r, atol=1e-5)
    assert jnp.allclose(l2_2, l2_2r, atol=1e-5)

    print("KERNEL_OK")
</pallas_src>

<mosaic_0001>
module attributes {stable_mosaic.version = 11 : i64} {
  func.func @mlp_kernel(%arg0: i32, %arg1: memref<8x32xf32, #tpu.memory_space<vmem>>, %arg2: memref<32x400xf32, #tpu.memory_space<vmem>>, %arg3: memref<1x400xf32, #tpu.memory_space<vmem>>, %arg4: memref<400x128xf32, #tpu.memory_space<vmem>>, %arg5: memref<1x128xf32, #tpu.memory_space<vmem>>, %arg6: memref<1x128xf32, #tpu.memory_space<vmem>>, %arg7: memref<1x1xf32, #tpu.memory_space<vmem>>, %arg8: memref<8x400xf32, #tpu.memory_space<vmem>>, %arg9: memref<8x128xf32, #tpu.memory_space<vmem>>) attributes {dimension_semantics = [#tpu.dimension_semantics<parallel>], iteration_bounds = array<i64: 1>, scalar_prefetch = 0 : i64, scratch_operands = 0 : i64, tpu.core_type = #tpu.core_type<tc>, window_params = [{transform_indices = @transform_0, window_bounds = array<i64: 8, 32>}, {pipeline_mode = #tpu.pipeline_mode<synchronous>, transform_indices = @transform_1, window_bounds = array<i64: 32, 400>}, {pipeline_mode = #tpu.pipeline_mode<synchronous>, transform_indices = @transform_2, window_bounds = array<i64: 1, 400>}, {pipeline_mode = #tpu.pipeline_mode<synchronous>, transform_indices = @transform_3, window_bounds = array<i64: 400, 128>}, {pipeline_mode = #tpu.pipeline_mode<synchronous>, transform_indices = @transform_4, window_bounds = array<i64: 1, 128>}, {pipeline_mode = #tpu.pipeline_mode<synchronous>, transform_indices = @transform_5, window_bounds = array<i64: 1, 128>}, {pipeline_mode = #tpu.pipeline_mode<synchronous>, transform_indices = @transform_6, window_bounds = array<i64: 1, 1>}, {transform_indices = @transform_7, window_bounds = array<i64: 8, 400>}, {transform_indices = @transform_8, window_bounds = array<i64: 8, 128>}]} {
    %c0 = arith.constant 0 : index
    %c0_0 = arith.constant 0 : index
    %0 = vector.load %arg1[%c0, %c0_0] : memref<8x32xf32, #tpu.memory_space<vmem>>, vector<8x32xf32>
    %c0_1 = arith.constant 0 : index
    %c0_2 = arith.constant 0 : index
    %1 = vector.load %arg2[%c0_1, %c0_2] : memref<32x400xf32, #tpu.memory_space<vmem>>, vector<32x400xf32>
    %cst = arith.constant dense<0.000000e+00> : vector<8x400xf32>
    %2 = tpu.matmul %0, %1, %cst {dimension_numbers = #tpu.dot_dimension_numbers<[1], [0], [0], [1], [0, 0, 1, 1], [], []>} : vector<8x32xf32>, vector<32x400xf32>, vector<8x400xf32> -> vector<8x400xf32>
    %c0_3 = arith.constant 0 : index
    %c0_4 = arith.constant 0 : index
    %3 = vector.load %arg3[%c0_3, %c0_4] : memref<1x400xf32, #tpu.memory_space<vmem>>, vector<1x400xf32>
    %4 = vector.broadcast %3 : vector<1x400xf32> to vector<8x400xf32>
    %5 = arith.addf %2, %4 : vector<8x400xf32>
    %cst_5 = arith.constant 0.000000e+00 : f32
    %6 = vector.broadcast %cst_5 : f32 to vector<8x400xf32>
    %7 = arith.maximumf %5, %6 : vector<8x400xf32>
    %c0_6 = arith.constant 0 : index
    %c0_7 = arith.constant 0 : index
    %8 = vector.load %arg8[%c0_6, %c0_7] : memref<8x400xf32, #tpu.memory_space<vmem>>, vector<8x400xf32>
    tpu.vector_store %arg8[%c0_6, %c0_7], %7 {strides = array<i32>} : memref<8x400xf32, #tpu.memory_space<vmem>>, vector<8x400xf32>,
    %c0_8 = arith.constant 0 : index
    %c0_9 = arith.constant 0 : index
    %9 = vector.load %arg4[%c0_8, %c0_9] : memref<400x128xf32, #tpu.memory_space<vmem>>, vector<400x128xf32>
    %cst_10 = arith.constant dense<0.000000e+00> : vector<8x128xf32>
    %10 = tpu.matmul %7, %9, %cst_10 {dimension_numbers = #tpu.dot_dimension_numbers<[1], [0], [0], [1], [0, 0, 1, 1], [], []>} : vector<8x400xf32>, vector<400x128xf32>, vector<8x128xf32> -> vector<8x128xf32>
    %c0_11 = arith.constant 0 : index
    %c0_12 = arith.constant 0 : index
    %11 = vector.load %arg5[%c0_11, %c0_12] : memref<1x128xf32, #tpu.memory_space<vmem>>, vector<1x128xf32>
    %12 = vector.broadcast %11 : vector<1x128xf32> to vector<8x128xf32>
    %13 = arith.addf %10, %12 : vector<8x128xf32>
    %cst_13 = arith.constant 0.000000e+00 : f32
    %14 = vector.broadcast %cst_13 : f32 to vector<8x128xf32>
    %15 = arith.maximumf %13, %14 : vector<8x128xf32>
    %c0_14 = arith.constant 0 : index
    %c0_15 = arith.constant 0 : index
    %16 = vector.load %arg6[%c0_14, %c0_15] : memref<1x128xf32, #tpu.memory_space<vmem>>, vector<1x128xf32>
    %17 = vector.broadcast %16 : vector<1x128xf32> to vector<8x128xf32>
    %18 = arith.mulf %15, %17 : vector<8x128xf32>
    %cst_16 = arith.constant dense<0.000000e+00> : vector<8xf32>
    %19 = vector.multi_reduction <add>, %18, %cst_16 [1] : vector<8x128xf32> to vector<8xf32>
    %20 = vector.shape_cast %19 : vector<8xf32> to vector<8x1xf32>
    %c0_17 = arith.constant 0 : index
    %c0_18 = arith.constant 0 : index
    %21 = vector.load %arg7[%c0_17, %c0_18] : memref<1x1xf32, #tpu.memory_space<vmem>>, vector<1x1xf32>
    %22 = vector.broadcast %21 : vector<1x1xf32> to vector<8x1xf32>
    %23 = arith.addf %20, %22 : vector<8x1xf32>
    %cst_19 = arith.constant 0.000000e+00 : f32
    %24 = vector.broadcast %cst_19 : f32 to vector<8x1xf32>
    %25 = arith.subf %24, %23 : vector<8x1xf32>
    %26 = math.exp %25 : vector<8x1xf32>
    %cst_20 = arith.constant 1.000000e+00 : f32
    %27 = vector.broadcast %cst_20 : f32 to vector<8x1xf32>
    %28 = arith.addf %27, %26 : vector<8x1xf32>
    %cst_21 = arith.constant 1.000000e+00 : f32
    %29 = vector.broadcast %cst_21 : f32 to vector<8x1xf32>
    %30 = arith.divf %29, %28 : vector<8x1xf32>
    %31 = tpu.iota {dimensions = array<i32: 1>} : vector<8x128xi32>
    %32 = vector.shape_cast %30 : vector<8x1xf32> to vector<8x1xf32>
    %33 = vector.broadcast %32 : vector<8x1xf32> to vector<8x128xf32>
    %c20_i32 = arith.constant 20 : i32
    %34 = vector.broadcast %c20_i32 : i32 to vector<8x128xi32>
    %35 = arith.cmpi eq, %31, %34 : vector<8x128xi32>
    %36 = arith.select %35, %33, %15 : vector<8x128xi1>, vector<8x128xf32>
    %c0_22 = arith.constant 0 : index
    %c0_23 = arith.constant 0 : index
    %37 = vector.load %arg9[%c0_22, %c0_23] : memref<8x128xf32, #tpu.memory_space<vmem>>, vector<8x128xf32>
    tpu.vector_store %arg9[%c0_22, %c0_23], %36 {strides = array<i32>} : memref<8x128xf32, #tpu.memory_space<vmem>>, vector<8x128xf32>,
    return
  }
  func.func @transform_0(%arg0: i32) -> (i32, i32) {
    %c0_i32 = arith.constant 0 : i32
    %c0_i32_0 = arith.constant 0 : i32
    return %arg0, %c0_i32 : i32, i32
  }
  func.func @transform_1(%arg0: i32) -> (i32, i32) {
    %c0_i32 = arith.constant 0 : i32
    %c0_i32_0 = arith.constant 0 : i32
    %c0_i32_1 = arith.constant 0 : i32
    return %c0_i32, %c0_i32_0 : i32, i32
  }
  func.func @transform_2(%arg0: i32) -> (i32, i32) {
    %c0_i32 = arith.constant 0 : i32
    %c0_i32_0 = arith.constant 0 : i32
    %c0_i32_1 = arith.constant 0 : i32
    return %c0_i32, %c0_i32_0 : i32, i32
  }
  func.func @transform_3(%arg0: i32) -> (i32, i32) {
    %c0_i32 = arith.constant 0 : i32
    %c0_i32_0 = arith.constant 0 : i32
    %c0_i32_1 = arith.constant 0 : i32
    return %c0_i32, %c0_i32_0 : i32, i32
  }
  func.func @transform_4(%arg0: i32) -> (i32, i32) {
    %c0_i32 = arith.constant 0 : i32
    %c0_i32_0 = arith.constant 0 : i32
    %c0_i32_1 = arith.constant 0 : i32
    return %c0_i32, %c0_i32_0 : i32, i32
  }
  func.func @transform_5(%arg0: i32) -> (i32, i32) {
    %c0_i32 = arith.constant 0 : i32
    %c0_i32_0 = arith.constant 0 : i32
    %c0_i32_1 = arith.constant 0 : i32
    return %c0_i32, %c0_i32_0 : i32, i32
  }
  func.func @transform_6(%arg0: i32) -> (i32, i32) {
    %c0_i32 = arith.constant 0 : i32
    %c0_i32_0 = arith.constant 0 : i32
    %c0_i32_1 = arith.constant 0 : i32
    return %c0_i32, %c0_i32_0 : i32, i32
  }
  func.func @transform_7(%arg0: i32) -> (i32, i32) {
    %c0_i32 = arith.constant 0 : i32
    %c0_i32_0 = arith.constant 0 : i32
    return %arg0, %c0_i32 : i32, i32
  }
  func.func @transform_8(%arg0: i32) -> (i32, i32) {
    %c0_i32 = arith.constant 0 : i32
    %c0_i32_0 = arith.constant 0 : i32
    return %arg0, %c0_i32 : i32, i32
  }
}

</mosaic_0001>

<bundles_post_ra>
// kernel: tpu_custom_call.1
= control target key start
LH: loop header
LB: loop body
LE: loop exit
PB: predicated region body
PF: predicated region fallthrough
CT: control target
= control target key end

     0   :  { %s923_s0 = inlined_call_operand.hbm [shape: f32[8,32], index: 0, kind: input, shape index: {}]   ;;  %s924_s1 = inlined_call_operand.hbm [shape: f32[32,400], index: 1, kind: input, shape index: {}]   ;;  %s925_s2 = inlined_call_operand.vmem [shape: f32[1,400], index: 2, kind: input, shape index: {}]   ;;  %s926_s3 = inlined_call_operand.hbm [shape: f32[400,128], index: 3, kind: input, shape index: {}]   ;;  %s927_s4 = inlined_call_operand.vmem [shape: f32[1,128], index: 4, kind: input, shape index: {}]   ;;  %s928_s5 = inlined_call_operand.vmem [shape: f32[1,128], index: 5, kind: input, shape index: {}]   ;;  %s929_s6 = inlined_call_operand.<no memory space> [shape: f32[1,1], index: 6, kind: input, shape index: {}]   ;;  %s930_s7 = inlined_call_operand.hbm [shape: f32[8,400], index: 7, kind: output, shape index: {0}]   ;;  %s931_s8 = inlined_call_operand.hbm [shape: f32[8,128], index: 8, kind: output, shape index: {1}]  }
   0x1   :  { %v14_v0 = vstv %s929_s6 }
   0x2   :  { %15 = vst [vmem:[#allocation2] sm:$0x1] %v14_v0 }
   0x3   :  { %16 = vsyncpa [#allocation4], 0 }
   0x4   :  { %17 = vsyncpa [#allocation7], 0 }
   0x5   :  { %18 = vsyncpa [#allocation5], 0 }
   0x6   :  { %19 = vsyncpa [#allocation11], 0  ;;  %s781_s29 = smov [#allocation6]   ;;  %s663_s11 = scalar_lea.hbm %s924_s1, 2048 }
   0x7   :  { %s35_s30 = sshll.u32 %s781_s29, 4  ;;  %p664_p0 = scmp.ne.s32.totalorder %s924_s1, %s663_s11  ;;  %s36_s30 = int_to_ptr.vmem [resolvable:$true] %s35_s30 }
   0x8   :  { %p667_p1 = scmp.lt.u32.totalorder %s663_s11, %s924_s1 }
   0xa   :  { %p669_p2 = pnand %p667_p1, %p664_p0 }
   0xc   :  { %672 = shalt.err (!%p669_p2)
}
   0xd   :  { %s673_s6 = scalar_lea.vmem %s36_s30, 2048  ;;  %p678_p4 = scmp.lt.s32.totalorder %s36_s30, %s36_s30 }
   0xe   :  { %p674_p3 = scmp.ne.s32.totalorder %s36_s30, %s673_s6  ;;  %p679_p5 = scmp.lt.s32.totalorder %s673_s6, %s673_s6 }
  0x10   :  { %p680_p6 = por %p679_p5, %p678_p4 }
  0x12   :  { %p681_p7 = pnand %p680_p6, %p674_p3 }
  0x14   :  { %684 = shalt.err (!%p681_p7)
}
  0x15   :  { %s782_s16 = smov 512   ;;  %s783_s17 = smov 32  }
  0x16   :  { %41 = dma.hbm_to_vmem [thread:$0]  %s924_s1, 2048, %s36_s30, [#allocation7], %s782_s16, %s782_s16, %s783_s17  }
  0x17   :  { %s784_s20 = smov [#allocation3]   ;;  %s785_s22 = smov [#allocation8]  }
  0x18   :  { %s26_s21 = sshll.u32 %s784_s20, 4  ;;  %s49_s23 = sshll.u32 %s785_s22, 4  ;;  %s27_s21 = int_to_ptr.vmem [resolvable:$true] %s26_s21  ;;  %s50_s23 = int_to_ptr.vmem [resolvable:$true] %s49_s23 }
  0x19   :  { %s685_s26 = scalar_lea.hbm %s923_s0, 128 }
  0x1a   :  { %p686_p8 = scmp.ne.s32.totalorder %s923_s0, %s685_s26  ;;  %p689_p9 = scmp.lt.u32.totalorder %s685_s26, %s923_s0 }
  0x1c   :  { %p691_p10 = pnand %p689_p9, %p686_p8 }
  0x1e   :  { %694 = shalt.err (!%p691_p10)
}
  0x1f   :  { %s695_s1 = scalar_lea.vmem %s27_s21, 128  ;;  %p700_p12 = scmp.lt.s32.totalorder %s27_s21, %s27_s21 }
  0x20   :  { %p696_p11 = scmp.ne.s32.totalorder %s27_s21, %s695_s1  ;;  %p701_p13 = scmp.lt.s32.totalorder %s695_s1, %s695_s1 }
  0x22   :  { %p702_p0 = por %p701_p13, %p700_p12 }
  0x24   :  { %p703_p1 = pnand %p702_p0, %p696_p11 }
  0x26   :  { %706 = shalt.err (!%p703_p1)
}
  0x27   :  { %29 = dma.hbm_to_vmem [thread:$0]  %s923_s0, 128, %s27_s21, [#allocation4]  }
  0x28   :  { %s707_s13 = scalar_lea.hbm %s926_s3, 6400 }
  0x29   :  { %p708_p2 = scmp.ne.s32.totalorder %s926_s3, %s707_s13  ;;  %p711_p3 = scmp.lt.u32.totalorder %s707_s13, %s926_s3 }
  0x2b   :  { %p713_p4 = pnand %p711_p3, %p708_p2 }
  0x2d   :  { %716 = shalt.err (!%p713_p4)
}
  0x2e   :  { %s717_s17 = scalar_lea.vmem %s50_s23, 6400  ;;  %p722_p6 = scmp.lt.s32.totalorder %s50_s23, %s50_s23 }
  0x2f   :  { %p718_p5 = scmp.ne.s32.totalorder %s50_s23, %s717_s17  ;;  %p723_p7 = scmp.lt.s32.totalorder %s717_s17, %s717_s17 }
  0x31   :  { %p724_p8 = por %p723_p7, %p722_p6 }
  0x33   :  { %p725_p9 = pnand %p724_p8, %p718_p5 }
  0x35   :  { %728 = shalt.err (!%p725_p9)
}
  0x36   :  { %s786_s0 = smov 128   ;;  %s787_s18 = smov 8  }
  0x37   :  { %55 = dma.hbm_to_vmem [thread:$0]  %s926_s3, 6400, %s50_s23, [#allocation7], %s786_s0, %s786_s0, %s787_s18  }
  0x38   :  { %773 = dma.done.wait [#allocation4], 128  }
  0x39   :  { %774 = vsyncadd [#allocation4], 4294967168 }
  0x3a   :  { %775 = dma.done.wait [#allocation7], 8448  }
  0x3b   :  { %776 = vsyncadd [#allocation7], 4294958848  ;;  %v788_v1 = vmov 0.0   ;;  %v73_v2 = vld [vmem:[#allocation6 + $0x8] sm:$0xff]  ;;  %v72_v4 = vld [vmem:[#allocation6] sm:$0xff]  ;;  %vm110_vm0 = vcmask 261120  }
  0x3c   :  { %178 = vmatprep.mubr.f32.mxu0 %v788_v1  ;;  %249 = vmatprep.mubr.f32.mxu1 %v788_v1  ;;  %v77_v3 = vld [vmem:[#allocation6 + $0x28] sm:$0xff]  ;;  %v76_v6 = vld [vmem:[#allocation6 + $0x20] sm:$0xff]  ;;  %v75_v7 = vld [vmem:[#allocation6 + $0x18] sm:$0xff]  ;;  %v789_v42 = vmov 0.0|0.0   ;;  %vm263_vm1 = vcmask 130048  }
  0x3d   :  { %v571_v5 = vpack.c.bf16 %v77_v3, %v73_v2  ;;  %v79_v8 = vld [vmem:[#allocation6 + $0x38] sm:$0xff]  ;;  %v573_v9 = vpack.c.bf16 %v76_v6, %v72_v4  ;;  %v74_v11 = vld [vmem:[#allocation6 + $0x10] sm:$0xff]  ;;  %v81_v13 = vld [vmem:[#allocation6 + $0x48] sm:$0xff] }
  0x3e   :  { %v579_v10 = vpack.c.bf16 %v79_v8, %v75_v7  ;;  %v78_v12 = vld [vmem:[#allocation6 + $0x30] sm:$0xff]  ;;  %v85_v15 = vld [vmem:[#allocation6 + $0x68] sm:$0xff]  ;;  %v80_v16 = vld [vmem:[#allocation6 + $0x40] sm:$0xff] }
  0x3f   :  { %572 = vmatprep.subr.bf16.mxu0 %v571_v5  ;;  %v581_v14 = vpack.c.bf16 %v78_v12, %v74_v11  ;;  %v84_v17 = vld [vmem:[#allocation6 + $0x60] sm:$0xff]  ;;  %v575_v18 = vpack.c.bf16 %v85_v15, %v81_v13  ;;  %v83_v20 = vld [vmem:[#allocation6 + $0x58] sm:$0xff]  ;;  %v82_v22 = vld [vmem:[#allocation6 + $0x50] sm:$0xff] }
  0x40   :  { %574 = vmatpush1.bf16.msra.mxu0 %v573_v9  ;;  %580 = vmatprep.subr.bf16.mxu1 %v579_v10  ;;  %v577_v19 = vpack.c.bf16 %v84_v17, %v80_v16  ;;  %v87_v21 = vld [vmem:[#allocation6 + $0x78] sm:$0xff]  ;;  %v86_v24 = vld [vmem:[#allocation6 + $0x70] sm:$0xff]  ;;  %v297_v25 = vld [vmem:[#allocation8 + $0x100] sm:$0xff] }
  0x41   :  { %582 = vmatpush1.bf16.msra.mxu1 %v581_v14  ;;  %v583_v23 = vpack.c.bf16 %v87_v21, %v83_v20  ;;  %576 = vmatprep.subr.bf16.mxu0 %v575_v18  ;;  %v585_v26 = vpack.c.bf16 %v86_v24, %v82_v22  ;;  %v298_v27 = vld [vmem:[#allocation8 + $0x108] sm:$0xff]  ;;  %v281_v28 = vld [vmem:[#allocation8 + $0x80] sm:$0xff]  ;;  %v71_v33 = vld [vmem:[#allocation3] sm:$0xff] }
  0x42   :  { %v282_v29 = vld [vmem:[#allocation8 + $0x88] sm:$0xff]  ;;  %v265_v31 = vld [vmem:[#allocation8] sm:$0xff]  ;;  %v283_v35 = vld [vmem:[#allocation8 + $0x90] sm:$0xff]  ;;  %v620_v37 = vpack.c.bf16 %v298_v27, %v297_v25 }
  0x43   :  { %584 = vmatprep.subr.bf16.mxu1 %v583_v23  ;;  %v587_v30 = vpack.c.bf16 %v282_v29, %v281_v28  ;;  %v266_v32 = vld [vmem:[#allocation8 + $0x8] sm:$0xff]  ;;  %v284_v36 = vld [vmem:[#allocation8 + $0x98] sm:$0xff]  ;;  %v299_v38 = vld [vmem:[#allocation8 + $0x110] sm:$0xff] }
  0x44   :  { %578 = vmatpush1.bf16.msra.mxu0 %v577_v19  ;;  %v589_v34 = vpack.c.bf16 %v266_v32, %v265_v31  ;;  %v591_v39 = vpack.c.bf16 %v284_v36, %v283_v35  ;;  %v267_v40 = vld [vmem:[#allocation8 + $0x10] sm:$0xff]  ;;  %v268_v41 = vld [vmem:[#allocation8 + $0x18] sm:$0xff]  ;;  %v285_v44 = vld [vmem:[#allocation8 + $0xa0] sm:$0xff] }
  0x45   :  { %586 = vmatpush1.bf16.msra.mxu1 %v585_v26  ;;  %588 = vmatprep.subr.bf16.mxu0 %v587_v30  ;;  %v300_v43 = vld [vmem:[#allocation8 + $0x118] sm:$0xff]  ;;  %v286_v45 = vld [vmem:[#allocation8 + $0xa8] sm:$0xff]  ;;  %v593_v46 = vpack.c.bf16 %v268_v41, %v267_v40  ;;  %v301_v48 = vld [vmem:[#allocation8 + $0x120] sm:$0xff] }
  0x46   :  { %619 = vmatprep.subr.bf16.mxu1 %v789_v42  ;;  %v623_v47 = vpack.c.bf16 %v300_v43, %v299_v38  ;;  %v595_v49 = vpack.c.bf16 %v286_v45, %v285_v44  ;;  %v269_v50 = vld [vmem:[#allocation8 + $0x20] sm:$0xff]  ;;  %v270_v51 = vld [vmem:[#allocation8 + $0x28] sm:$0xff]  ;;  %v287_v53 = vld [vmem:[#allocation8 + $0xb0] sm:$0xff] }
  0x47   :  { %530 = vmatmul.mubr.msk.f32.vlgmr.msra.gmra.mrb[0].mxu0 %vm110_vm0, %v71_v33  ;;  %v302_v52 = vld [vmem:[#allocation8 + $0x128] sm:$0xff]  ;;  %v288_v54 = vld [vmem:[#allocation8 + $0xb8] sm:$0xff]  ;;  %v597_v55 = vpack.c.bf16 %v270_v51, %v269_v50  ;;  %v303_v57 = vld [vmem:[#allocation8 + $0x130] sm:$0xff] }
  0x48   :  { %531 = vmatmul.mubr.msk.f32.vlgmr.msra.gmra.mrb[0].mxu1 %vm110_vm0, %v71_v33  ;;  %590 = vmatpush3.bf16.msra.mxu0 %v589_v34  ;;  %v626_v56 = vpack.c.bf16 %v302_v52, %v301_v48  ;;  %v599_v58 = vpack.c.bf16 %v288_v54, %v287_v53  ;;  %v271_v59 = vld [vmem:[#allocation8 + $0x30] sm:$0xff]  ;;  %v272_v60 = vld [vmem:[#allocation8 + $0x38] sm:$0xff]  ;;  %v289_v62 = vld [vmem:[#allocation8 + $0xc0] sm:$0xff] }
  0x49   :  { %621 = vmatpush1.bf16.msra.mxu1 %v620_v37  ;;  %592 = vmatprep.subr.bf16.mxu0 %v591_v39  ;;  %v304_v61 = vld [vmem:[#allocation8 + $0x138] sm:$0xff]  ;;  %v290_v63 = vld [vmem:[#allocation8 + $0xc8] sm:$0xff]  ;;  %v601_v0 = vpack.c.bf16 %v272_v60, %v271_v59  ;;  %v305_v2 = vld [vmem:[#allocation8 + $0x140] sm:$0xff]  ;;  %v90_v39 = vlaneseq }
  0x4a   :  { %622 = vmatprep.subr.bf16.mxu1 %v789_v42  ;;  %v629_v1 = vpack.c.bf16 %v304_v61, %v303_v57  ;;  %v603_v3 = vpack.c.bf16 %v290_v63, %v289_v62  ;;  %v273_v4 = vld [vmem:[#allocation8 + $0x40] sm:$0xff]  ;;  %v274_v5 = vld [vmem:[#allocation8 + $0x48] sm:$0xff]  ;;  %v291_v7 = vld [vmem:[#allocation8 + $0xd0] sm:$0xff] }
  0x4b   :  { %v306_v6 = vld [vmem:[#allocation8 + $0x148] sm:$0xff]  ;;  %v292_v8 = vld [vmem:[#allocation8 + $0xd8] sm:$0xff]  ;;  %v605_v9 = vpack.c.bf16 %v274_v5, %v273_v4  ;;  %v307_v11 = vld [vmem:[#allocation8 + $0x150] sm:$0xff]  ;;  %v91_v40 = vshrl.u32 %v90_v39, 7 }
  0x4c   :  { %594 = vmatpush3.bf16.msra.mxu0 %v593_v46  ;;  %v632_v10 = vpack.c.bf16 %v306_v6, %v305_v2  ;;  %v607_v12 = vpack.c.bf16 %v292_v8, %v291_v7  ;;  %v275_v13 = vld [vmem:[#allocation8 + $0x50] sm:$0xff]  ;;  %v276_v14 = vld [vmem:[#allocation8 + $0x58] sm:$0xff]  ;;  %v293_v16 = vld [vmem:[#allocation8 + $0xe0] sm:$0xff] }
  0x4d   :  { %624 = vmatpush1.bf16.msra.mxu1 %v623_v47  ;;  %596 = vmatprep.subr.bf16.mxu0 %v595_v49  ;;  %v308_v15 = vld [vmem:[#allocation8 + $0x158] sm:$0xff]  ;;  %v294_v17 = vld [vmem:[#allocation8 + $0xe8] sm:$0xff]  ;;  %v609_v18 = vpack.c.bf16 %v276_v14, %v275_v13  ;;  %v309_v21 = vld [vmem:[#allocation8 + $0x160] sm:$0xff]  ;;  %v92_v41 = vsub.s32 0, %v91_v40  ;;  %v96_v44 = vsub.s32 1, %v91_v40  ;;  %v100_v45 = vsub.s32 2, %v91_v40 }
  0x4e   :  { %625 = vmatprep.subr.bf16.mxu1 %v789_v42  ;;  %v635_v19 = vpack.c.bf16 %v308_v15, %v307_v11  ;;  %v611_v20 = vpack.c.bf16 %v294_v17, %v293_v16  ;;  %v310_v22 = vld [vmem:[#allocation8 + $0x168] sm:$0xff]  ;;  %v277_v24 = vld [vmem:[#allocation8 + $0x60] sm:$0xff]  ;;  %v311_v27 = vld [vmem:[#allocation8 + $0x170] sm:$0xff]  ;;  %v104_v46 = vsub.s32 3, %v91_v40 }
  0x4f   :  { %v638_v23 = vpack.c.bf16 %v310_v22, %v309_v21  ;;  %v278_v25 = vld [vmem:[#allocation8 + $0x68] sm:$0xff]  ;;  %v312_v28 = vld [vmem:[#allocation8 + $0x178] sm:$0xff]  ;;  %v295_v30 = vld [vmem:[#allocation8 + $0xf0] sm:$0xff] }
  0x50   :  { %598 = vmatpush3.bf16.msra.mxu0 %v597_v55  ;;  %v613_v26 = vpack.c.bf16 %v278_v25, %v277_v24  ;;  %v641_v29 = vpack.c.bf16 %v312_v28, %v311_v27  ;;  %v296_v31 = vld [vmem:[#allocation8 + $0xf8] sm:$0xff]  ;;  %v279_v33 = vld [vmem:[#allocation8 + $0x70] sm:$0xff]  ;;  %v313_v36 = vld [vmem:[#allocation8 + $0x180] sm:$0xff] }
  0x51   :  { %627 = vmatpush1.bf16.msra.mxu1 %v626_v56  ;;  %600 = vmatprep.subr.bf16.mxu0 %v599_v58  ;;  %v615_v32 = vpack.c.bf16 %v296_v31, %v295_v30  ;;  %v280_v34 = vld [vmem:[#allocation8 + $0x78] sm:$0xff]  ;;  %v314_v37 = vld [vmem:[#allocation8 + $0x188] sm:$0xff]  ;;  %v534_v6 = vld [vmem:[%s928_s5] ss:$0 sm:$0xff] }
  0x52   :  { %628 = vmatprep.subr.bf16.mxu1 %v789_v42  ;;  %v617_v35 = vpack.c.bf16 %v280_v34, %v279_v33  ;;  %v644_v38 = vpack.c.bf16 %v314_v37, %v313_v36  ;;  %v88_v43 = vld [vmem:[%s925_s2] sm:$0xf] }
  0x53   :  { %v93_v47 = vrot.slane %v88_v43, %v92_v41  ;;  %v97_v48 = vrot.slane %v88_v43, %v96_v44  ;;  %v101_v49 = vrot.slane %v88_v43, %v100_v45 }
  0x54   :  { %602 = vmatpush3.bf16.msra.mxu0 %v601_v0  ;;  %v532_v0 = vld [vmem:[%s927_s4] ss:$0 sm:$0xff]  ;;  %s791_s4 = smov [#allocation9]  }
  0x55   :  { %630 = vmatpush1.bf16.msra.mxu1 %v629_v1  ;;  %604 = vmatprep.subr.bf16.mxu0 %v603_v3  ;;  %s506_s25 = sshll.u32 %s791_s4, 4  ;;  %s507_s25 = int_to_ptr.vmem [resolvable:$true] %s506_s25 }
  0x56   :  { %631 = vmatprep.subr.bf16.mxu1 %v789_v42  ;;  %s729_s5 = scalar_lea.vmem %s507_s25, 512  ;;  %p734_p11 = scmp.lt.s32.totalorder %s507_s25, %s507_s25 }
  0x57   :  { %p730_p10 = scmp.ne.s32.totalorder %s507_s25, %s729_s5  ;;  %p735_p12 = scmp.lt.s32.totalorder %s729_s5, %s729_s5 }
  0x58   :  { %606 = vmatpush3.bf16.msra.mxu0 %v605_v9  ;;  %v790_v9 = vmov 0  }
  0x59   :  { %633 = vmatpush1.bf16.msra.mxu1 %v632_v10  ;;  %608 = vmatprep.subr.bf16.mxu0 %v607_v12  ;;  %v535_v10 = vld [vmem:[#allocation2] ss:$0 sm:$0xff]  ;;  %p736_p13 = por %p735_p12, %p734_p11 }
  0x5a   :  { %634 = vmatprep.subr.bf16.mxu1 %v789_v42  ;;  %658 = vset.pattern.permute.xlu0 %v790_v9 }
  0x5b   :  { %p737_p0 = pnand %p736_p13, %p730_p10 }
  0x5c   :  { %610 = vmatpush3.bf16.msra.mxu0 %v609_v18 }
  0x5d   :  { %636 = vmatpush1.bf16.msra.mxu1 %v635_v19  ;;  %612 = vmatprep.subr.bf16.mxu0 %v611_v20 }
  0x5e   :  { %637 = vmatprep.subr.bf16.mxu1 %v789_v42 }
  0x60   :  { %614 = vmatpush3.bf16.msra.mxu0 %v613_v26 }
  0x61   :  { %639 = vmatpush1.bf16.msra.mxu1 %v638_v23  ;;  %616 = vmatprep.subr.bf16.mxu0 %v615_v32 }
  0x62   :  { %640 = vmatprep.subr.bf16.mxu1 %v789_v42 }
  0x64   :  { %618 = vmatpush3.bf16.msra.mxu0 %v617_v35 }
  0x65   :  { %642 = vmatpush1.bf16.msra.mxu1 %v641_v29 }
  0x66   :  { %643 = vmatprep.subr.bf16.mxu1 %v789_v42  ;;  %v105_v42 = vrot.slane %v88_v43, %v104_v46 }
  0x69   :  { %645 = vmatpush1.bf16.msra.mxu1 %v644_v38 }
 0x11a   :  { %v180_v50 = vpop.f32.mrb[0].mxu0 }
 0x11b   :  { %v181_v51 = vadd.f32 %v180_v50, %v93_v47  ;;  %v182_v52 = vpop.f32.mrb[1].mxu0  ;;  %v251_v53 = vpop.f32.mrb[0].mxu1 }
 0x11c   :  { %v183_v54 = vadd.f32 %v182_v52, %v97_v48  ;;  %v252_v55 = vadd.f32 %v251_v53, %v101_v49  ;;  %v253_v56 = vpop.f32.mrb[1].mxu1 }
 0x11d   :  { %v256_v57 = vmax.f32 %v181_v51, 0.0  ;;  %v254_v58 = vadd.f32 %v253_v56, %v105_v42 }
 0x11e   :  { %v257_v59 = vmax.f32 %v183_v54, 0.0  ;;  %v258_v60 = vmax.f32 %v252_v55, 0.0 }
 0x11f   :  { %260 = vst [vmem:[#allocation9] sm:$0xff] %v256_v57  ;;  %v259_v61 = vmax.f32 %v254_v58, 0.0 }
 0x120   :  { %261 = vst [vmem:[#allocation9 + $0x8] sm:$0xff] %v257_v59  ;;  %262 = vst [vmem:[#allocation9 + $0x10] sm:$0xff] %v258_v60  ;;  %389 = vmatprep.mubr.f32.mxu0 %v257_v59 }
 0x121   :  { %390 = vmatmul.mubr.f32.vlgmr.msra.gmra.mrb[2].mxu0 %v256_v57  ;;  %264 = vst.msk [vmem:[#allocation9 + $0x18] sm:$0xff] %vm263_vm1, %v259_v61  ;;  %533 = vmatprep.mubr.msk.f32.mxu1 %vm263_vm1, %v259_v61 }
 0x122   :  { %460 = vmatmul.mubr.f32.vlgmr.msra.gmra.mrb[2].mxu1 %v258_v60 }
 0x1f4   :  { %v568_v62 = vpop.f32.mrb[2].mxu0 }
 0x1f5   :  { %v569_v63 = vpop.f32.mrb[3].mxu0  ;;  %v461_v1 = vpop.f32.mrb[2].mxu1 }
 0x1f6   :  { %v570_v2 = vadd.f32 %v569_v63, %v568_v62  ;;  %v463_v3 = vpop.f32.mrb[3].mxu1 }
 0x1f8   :  { %v392_v4 = vadd.f32 %v570_v2, %v532_v0 }
 0x1fa   :  { %v462_v5 = vadd.f32 %v461_v1, %v392_v4 }
 0x1fc   :  { %v465_v7 = vmax.f32 %v462_v5, 0.0 }
 0x1fe   :  { %v473_v8 = vmul.f32 %v534_v6, %v465_v7 }
 0x200   :  { %474 = vadd.xlane.f32.xlu0 %v473_v8 }
 0x28d   :  { %v475_v11 = vpop.xlane.xlu0 %474 }
 0x28e   :  { %v483_v12 = vadd.f32 %v535_v10, %v475_v11 }
 0x290   :  { %v484_v13 = vsub.f32 0.0, %v483_v12 }
 0x292   :  { %v485_v14 = vmul.f32 1.442695, %v484_v13 }
 0x294   :  { %659 = vpow2.f32 %v485_v14 }
 0x29e   :  { %v660_v15 = vpop.eup %659 }
 0x29f   :  { %v487_v16 = vadd.f32 1.0, %v660_v15 }
 0x2a1   :  { %661 = vrcp.f32 %v487_v16 }
 0x2ab   :  { %v662_v17 = vpop.eup %661 }
 0x2ac   :  { %494 = vperm.xlu0 %658, %v662_v17  }
 0x2ad   :  { %740 = shalt.err (!%p737_p0)
}
 0x2ae   :  { %s741_s28 = scalar_lea.hbm %s930_s7, 512 }
 0x2af   :  { %p742_p1 = scmp.ne.s32.totalorder %s930_s7, %s741_s28  ;;  %p745_p2 = scmp.lt.u32.totalorder %s741_s28, %s930_s7 }
 0x2b1   :  { %p747_p3 = pnand %p745_p2, %p742_p1 }
 0x2b3   :  { %750 = shalt.err (!%p747_p3)
}
 0x2b4   :  { %509 = dma.vmem_to_hbm [thread:$0]  %s507_s25, 512, %s930_s7, [#allocation5]   ;;  %v491_v18 = vand.u32 127, %v90_v39 }
 0x2b5   :  { %s792_s12 = smov [#allocation10]  }
 0x2b6   :  { %s516_s13 = sshll.u32 %s792_s12, 4  ;;  %vm497_vm2 = vcmp.eq.s32.totalorder %v491_v18, 20  ;;  %s517_s13 = int_to_ptr.vmem [resolvable:$true] %s516_s13 }
 0x2b7   :  { %s751_s14 = scalar_lea.vmem %s517_s13, 128  ;;  %p756_p5 = scmp.lt.s32.totalorder %s517_s13, %s517_s13 }
 0x2b8   :  { %p752_p4 = scmp.ne.s32.totalorder %s517_s13, %s751_s14  ;;  %p757_p6 = scmp.lt.s32.totalorder %s751_s14, %s751_s14 }
 0x2ba   :  { %p758_p7 = por %p757_p6, %p756_p5 }
 0x2bc   :  { %p759_p8 = pnand %p758_p7, %p752_p4 }
 0x32b   :  { %v495_v19 = vpop.permute.xlu0 %494 }
 0x32c   :  { %v498_v20 = vsel %vm497_vm2, %v495_v19, %v465_v7 }
 0x32d   :  { %499 = vst [vmem:[#allocation10] sm:$0xff] %v498_v20 }
 0x32e   :  { %762 = shalt.err (!%p759_p8)
}
 0x32f   :  { %s763_s7 = scalar_lea.hbm %s931_s8, 128 }
 0x330   :  { %p764_p9 = scmp.ne.s32.totalorder %s931_s8, %s763_s7  ;;  %p767_p10 = scmp.lt.u32.totalorder %s763_s7, %s931_s8 }
 0x332   :  { %p769_p11 = pnand %p767_p10, %p764_p9 }
 0x334   :  { %772 = shalt.err (!%p769_p11)
}
 0x335   :  { %519 = dma.vmem_to_hbm [thread:$0]  %s517_s13, 128, %s931_s8, [#allocation11]  }
 0x336   :  { %777 = dma.done.wait [#allocation5], 512  }
 0x337   :  { %778 = vsyncadd [#allocation5], 4294966784 }
 0x338   :  { %779 = dma.done.wait [#allocation11], 128  }
 0x339   :  { %780 = vsyncadd [#allocation11], 4294967168 }
 0x33a   :  { %526 = vsyncpa [#allocation4], 1 }
 0x33b   :  { %527 = vsyncpa [#allocation7], 1 }
 0x33c   :  { %528 = vsyncpa [#allocation5], 1 }
 0x33d   :  { %529 = vsyncpa [#allocation11], 1 }

</bundles_post_ra>
